<compile_context>
chip_gen: v6e
topology: v6e:2x2x1
jax: 0.10.0
libtpu: 0.0.40
codegen_flags: <defaults>
</compile_context>

<pallas_src>
import math
import functools

import jax
import jax.numpy as jnp
from jax import lax
from jax.experimental import pallas as pl
from jax.experimental.pallas import tpu as pltpu

_EPS = 1e-5
_VMEM_LIMIT = 32 * 1024 * 1024          # safe on v5e/v6e/v7x scoped VMEM
_TM_CAP = 512                            # tile caps sized for v7x 64 MiB VMEM
_TN_CAP = 256                            # (v5e users may prefer 128 here)
_TK_CAP = 256


# ----------------------------------------------------------------------------
# Helpers mirroring the PyTorch-side config math
# ----------------------------------------------------------------------------
def is_power2(n):
    return n > 0 and (n & (n - 1)) == 0


def calculate_padding(kernel_size, stride):
    return kernel_size - stride


def _round_up(n, m):
    return ((n + m - 1) // m) * m


def _tile(dim, cap, align):
    """Pick a tile size: full (aligned) extent if it fits under cap, else cap."""
    return min(cap, _round_up(dim, align))


def _pad2d(x, rows, cols):
    pr, pc = rows - x.shape[0], cols - x.shape[1]
    if pr == 0 and pc == 0:
        return x
    return jnp.pad(x, ((0, pr), (0, pc)))


# ----------------------------------------------------------------------------
# Pallas kernels (hot path)
# ----------------------------------------------------------------------------
def _gemm_kernel(a_ref, b_ref, o_ref, acc_ref):
    # a: (tm, tk) bf16, b: (tk, tn) bf16, o: (tm, tn) f32, acc: (tm, tn) f32
    @pl.when(pl.program_id(2) == 0)
    def _init():
        acc_ref[...] = jnp.zeros_like(acc_ref)

    acc_ref[...] += jnp.dot(a_ref[...], b_ref[...],
                            preferred_element_type=jnp.float32)

    @pl.when(pl.program_id(2) == pl.num_programs(2) - 1)
    def _finalize():
        o_ref[...] = acc_ref[...].astype(o_ref.dtype)


def _gemm_bias_tanh_kernel(a_ref, b_ref, bias_ref, o_ref, acc_ref):
    # Head layer: conv + bias + tanh fused into the GEMM finalize.
    @pl.when(pl.program_id(2) == 0)
    def _init():
        acc_ref[...] = jnp.zeros_like(acc_ref)

    acc_ref[...] += jnp.dot(a_ref[...], b_ref[...],
                            preferred_element_type=jnp.float32)

    @pl.when(pl.program_id(2) == pl.num_programs(2) - 1)
    def _finalize():
        o_ref[...] = jnp.tanh(acc_ref[...] + bias_ref[...]).astype(o_ref.dtype)


def _bn_sums_kernel(y_ref, s_ref, q_ref):
    # Accumulate per-channel sum and sum-of-squares across the M grid axis.
    @pl.when(pl.program_id(0) == 0)
    def _init():
        s_ref[...] = jnp.zeros_like(s_ref)
        q_ref[...] = jnp.zeros_like(q_ref)

    y = y_ref[...]
    s_ref[...] += jnp.sum(y, axis=0, keepdims=True)
    q_ref[...] += jnp.sum(y * y, axis=0, keepdims=True)


def _scale_shift_relu_kernel(y_ref, sc_ref, sh_ref, o_ref):
    # Single FMA pass: y * scale + shift, then ReLU.  Epilogue stays f32.
    o_ref[...] = jnp.maximum(y_ref[...] * sc_ref[...] + sh_ref[...],
                             0.0).astype(o_ref.dtype)


# ----------------------------------------------------------------------------
# pallas_call wrappers
# ----------------------------------------------------------------------------
def _tiled_matmul(a, b, *, tm, tn, tk, bias=None, out_dtype=jnp.float32):
    mp, kp = a.shape
    _, np_ = b.shape
    grid = (mp // tm, np_ // tn, kp // tk)

    in_specs = [
        pl.BlockSpec((tm, tk), lambda i, j, kk: (i, kk)),
        pl.BlockSpec((tk, tn), lambda i, j, kk: (kk, j)),
    ]
    operands = [a, b]
    if bias is None:
        kernel = _gemm_kernel
    else:
        kernel = _gemm_bias_tanh_kernel
        in_specs.append(pl.BlockSpec((1, tn), lambda i, j, kk: (0, j)))
        operands.append(bias)

    return pl.pallas_call(
        kernel,
        out_shape=jax.ShapeDtypeStruct((mp, np_), out_dtype),
        grid=grid,
        in_specs=in_specs,
        out_specs=pl.BlockSpec((tm, tn), lambda i, j, kk: (i, j)),
        scratch_shapes=[pltpu.VMEM((tm, tn), jnp.float32)],
        compiler_params=pltpu.CompilerParams(
            dimension_semantics=("parallel", "parallel", "arbitrary"),
            vmem_limit_bytes=_VMEM_LIMIT,
        ),
    )(*operands)


def _bn_sums(y, *, tm):
    mp, np_ = y.shape
    grid = (mp // tm,)
    return pl.pallas_call(
        _bn_sums_kernel,
        out_shape=(jax.ShapeDtypeStruct((1, np_), jnp.float32),
                   jax.ShapeDtypeStruct((1, np_), jnp.float32)),
        grid=grid,
        in_specs=[pl.BlockSpec((tm, np_), lambda i: (i, 0))],
        out_specs=(pl.BlockSpec((1, np_), lambda i: (0, 0)),
                   pl.BlockSpec((1, np_), lambda i: (0, 0))),
        compiler_params=pltpu.CompilerParams(
            dimension_semantics=("arbitrary",),
            vmem_limit_bytes=_VMEM_LIMIT,
        ),
    )(y)


def _bn_apply_relu(y, scale, shift, *, tm, tn, out_dtype):
    mp, np_ = y.shape
    grid = (mp // tm, np_ // tn)
    return pl.pallas_call(
        _scale_shift_relu_kernel,
        out_shape=jax.ShapeDtypeStruct((mp, np_), out_dtype),
        grid=grid,
        in_specs=[
            pl.BlockSpec((tm, tn), lambda i, j: (i, j)),
            pl.BlockSpec((1, tn), lambda i, j: (0, j)),
            pl.BlockSpec((1, tn), lambda i, j: (0, j)),
        ],
        out_specs=pl.BlockSpec((tm, tn), lambda i, j: (i, j)),
        compiler_params=pltpu.CompilerParams(
            dimension_semantics=("parallel", "parallel"),
            vmem_limit_bytes=_VMEM_LIMIT,
        ),
    )(y,
      scale.reshape(1, np_).astype(jnp.float32),
      shift.reshape(1, np_).astype(jnp.float32))


# ----------------------------------------------------------------------------
# Glue: im2col patch extraction (plain JAX)
# ----------------------------------------------------------------------------
def im2col(x_nhwc, kh, kw, stride, pad):
    x = x_nhwc
    if pad:
        x = jnp.pad(x, ((0, 0), (pad, pad), (pad, pad), (0, 0)))
    n, h, w, c = x.shape
    oh = (h - kh) // stride + 1
    ow = (w - kw) // stride + 1
    pieces = []
    for di in range(kh):
        for dj in range(kw):
            pieces.append(x[:, di::stride, dj::stride, :][:, :oh, :ow, :])
    # patch feature ordering: (KH, KW, C) — matches weight reshape below
    p = jnp.concatenate(pieces, axis=-1)            # (N, OH, OW, KH*KW*C)
    return p.reshape(n * oh * ow, kh * kw * c), (n, oh, ow)


# ----------------------------------------------------------------------------
# Layer wrappers (NHWC in / NHWC out)
# ----------------------------------------------------------------------------
def conv_bn_relu_layer(x_nhwc, w_khwcio, gamma, beta, stride, pad):
    kh, kw, ic, oc = w_khwcio.shape
    patches, (n, oh, ow) = im2col(x_nhwc, kh, kw, stride, pad)
    m, k = patches.shape

    tm = _tile(m, _TM_CAP, 8)
    tk = _tile(k, _TK_CAP, 128)
    tn = _tile(oc, _TN_CAP, 128)
    mp, kp, ocp = _round_up(m, tm), _round_up(k, tk), _round_up(oc, tn)

    a = _pad2d(patches, mp, kp).astype(jnp.bfloat16)
    b = _pad2d(w_khwcio.reshape(k, oc), kp, ocp).astype(jnp.bfloat16)

    # Conv bias intentionally dropped: BatchNorm's mean subtraction cancels it.
    y = _tiled_matmul(a, b, tm=tm, tn=tn, tk=tk, out_dtype=jnp.float32)

    # Cross-tile batch statistics (correct under M tiling; zero-padded rows /
    # cols contribute nothing, so divide by the real M).
    s, q = _bn_sums(y, tm=tm)
    mean = s[0] / m
    var = jnp.maximum(q[0] / m - mean * mean, 0.0)
    gamma_p = jnp.pad(gamma, (0, ocp - oc))
    beta_p = jnp.pad(beta, (0, ocp - oc))
    scale = gamma_p * lax.rsqrt(var + _EPS)
    shift = beta_p - mean * scale

    out = _bn_apply_relu(y, scale, shift, tm=tm, tn=tn, out_dtype=jnp.bfloat16)
    return out[:m, :oc].reshape(n, oh, ow, oc)


def conv_tanh_layer(x_nhwc, w_khwcio, bias):
    kh, kw, ic, oc = w_khwcio.shape
    patches, (n, oh, ow) = im2col(x_nhwc, kh, kw, stride=1, pad=0)
    m, k = patches.shape

    tm = _tile(m, _TM_CAP, 8)
    tk = _tile(k, _TK_CAP, 128)
    tn = _tile(oc, _TN_CAP, 128)
    mp, kp, ocp = _round_up(m, tm), _round_up(k, tk), _round_up(oc, tn)

    a = _pad2d(patches, mp, kp).astype(jnp.bfloat16)
    b = _pad2d(w_khwcio.reshape(k, oc), kp, ocp).astype(jnp.bfloat16)
    bias_p = jnp.pad(bias, (0, ocp - oc)).reshape(1, ocp).astype(jnp.float32)

    y = _tiled_matmul(a, b, tm=tm, tn=tn, tk=tk, bias=bias_p,
                      out_dtype=jnp.float32)
    return y[:m, :oc].reshape(n, oh, ow, oc)


# ----------------------------------------------------------------------------
# ImageEncoder: parameter construction + forward
# ----------------------------------------------------------------------------
def build_image_encoder_params(config, img_size, key):
    if is_power2(max(img_size)):
        stable_dim = max(img_size)
    else:
        stable_dim = min(img_size)
    final_size_h = int(4 * img_size[0] // stable_dim) + 4
    final_size_w = int(4 * img_size[1] // stable_dim) + 3
    padding = calculate_padding(config['kernel_size'], config['stride'])
    num_layers = int(math.log2(max(img_size))) - 2

    layers = []
    hid_d = config['hid_d']
    k = config['kernel_size']
    for i in range(num_layers - 1):
        in_d = 3 if i == 0 else hid_d
        out_d = hid_d * 2
        key, k1, k2, k3 = jax.random.split(key, 4)
        fan_in = in_d * k * k
        w = jax.random.normal(k1, (k, k, in_d, out_d), jnp.float32) / math.sqrt(fan_in)
        # Conv bias omitted: exactly cancelled by the following BatchNorm.
        gamma = 1.0 + 0.1 * jax.random.normal(k2, (out_d,), jnp.float32)
        beta = 0.1 * jax.random.normal(k3, (out_d,), jnp.float32)
        layers.append(dict(kind='conv_bn_relu', w=w, gamma=gamma, beta=beta,
                           stride=config['stride'], pad=padding // 2))
        hid_d = out_d

    key, k1, k2 = jax.random.split(key, 3)
    fan_in = hid_d * final_size_h * final_size_w
    w = jax.random.normal(
        k1, (final_size_h, final_size_w, hid_d, config['out_d']), jnp.float32
    ) / math.sqrt(fan_in)
    b = 0.1 * jax.random.normal(k2, (config['out_d'],), jnp.float32)
    layers.append(dict(kind='conv_tanh', w=w, b=b))
    return layers


def image_encoder_forward(params, x_nchw):
    # NCHW -> NHWC once at the boundary; activations stay NHWC between layers.
    x = jnp.transpose(x_nchw, (0, 2, 3, 1))
    img_latent = []
    for layer in params:
        if layer['kind'] == 'conv_bn_relu':
            x = conv_bn_relu_layer(x, layer['w'], layer['gamma'],
                                   layer['beta'], layer['stride'], layer['pad'])
        else:
            x = conv_tanh_layer(x, layer['w'], layer['b'])
        # Returned latents follow the PyTorch NCHW convention (f32).
        img_latent.append(jnp.transpose(x, (0, 3, 1, 2)).astype(jnp.float32))

    # Reproduce .squeeze(-1).squeeze(-1): only drops trailing dims of size 1.
    last = img_latent[-1]
    if last.shape[-1] == 1:
        last = jnp.squeeze(last, axis=-1)
    if last.shape[-1] == 1:
        last = jnp.squeeze(last, axis=-1)
    img_latent[-1] = last
    return img_latent


# ----------------------------------------------------------------------------
if __name__ == "__main__":
    config = {'hid_d': 4, 'out_d': 8, 'kernel_size': 4, 'stride': 2}
    img_size = (16, 16)

    key = jax.random.PRNGKey(0)
    key, pkey, xkey = jax.random.split(key, 3)
    params = build_image_encoder_params(config, img_size, pkey)

    # PyTorch-convention NCHW input
    x = jax.random.normal(xkey, (2, 3, img_size[0], img_size[1]), jnp.float32)

    fwd = jax.jit(functools.partial(image_encoder_forward, params))
    outs = fwd(x)
    outs = [jax.block_until_ready(o) for o in outs]

    # Expected shapes for (16,16): layer0 -> (2, 8, 8, 8); head -> (2, 8, 1, 2)
    assert outs[0].shape == (2, config['hid_d'] * 2, 8, 8)
    assert outs[-1].shape[:2] == (2, config['out_d'])
    print("KERNEL_OK")
</pallas_src>

<mosaic_0001>
module attributes {stable_mosaic.version = 11 : i64} {
  func.func @_bn_sums_kernel(%arg0: i32, %arg1: memref<128x128xf32, #tpu.memory_space<vmem>>, %arg2: memref<1x128xf32, #tpu.memory_space<vmem>>, %arg3: memref<1x128xf32, #tpu.memory_space<vmem>>) attributes {dimension_semantics = [#tpu.dimension_semantics<arbitrary>], iteration_bounds = array<i64: 1>, scalar_prefetch = 0 : i64, scratch_operands = 0 : i64, tpu.core_type = #tpu.core_type<tc>, window_params = [{transform_indices = @transform_0, window_bounds = array<i64: 128, 128>}, {pipeline_mode = #tpu.pipeline_mode<synchronous>, transform_indices = @transform_1, window_bounds = array<i64: 1, 128>}, {pipeline_mode = #tpu.pipeline_mode<synchronous>, transform_indices = @transform_2, window_bounds = array<i64: 1, 128>}]} {
    %c0_i32 = arith.constant 0 : i32
    %0 = arith.cmpi eq, %arg0, %c0_i32 : i32
    %1 = arith.extui %0 : i1 to i32
    %c0_i32_0 = arith.constant 0 : i32
    %2 = arith.cmpi ne, %1, %c0_i32_0 : i32
    scf.if %2 {
      %cst_11 = arith.constant 0.000000e+00 : f32
      %15 = vector.broadcast %cst_11 : f32 to vector<1x128xf32>
      %c0_12 = arith.constant 0 : index
      %c0_13 = arith.constant 0 : index
      %16 = vector.load %arg2[%c0_12, %c0_13] : memref<1x128xf32, #tpu.memory_space<vmem>>, vector<1x128xf32>
      tpu.vector_store %arg2[%c0_12, %c0_13], %15 {strides = array<i32>} : memref<1x128xf32, #tpu.memory_space<vmem>>, vector<1x128xf32>,
      %cst_14 = arith.constant 0.000000e+00 : f32
      %17 = vector.broadcast %cst_14 : f32 to vector<1x128xf32>
      %c0_15 = arith.constant 0 : index
      %c0_16 = arith.constant 0 : index
      %18 = vector.load %arg3[%c0_15, %c0_16] : memref<1x128xf32, #tpu.memory_space<vmem>>, vector<1x128xf32>
      tpu.vector_store %arg3[%c0_15, %c0_16], %17 {strides = array<i32>} : memref<1x128xf32, #tpu.memory_space<vmem>>, vector<1x128xf32>,
    } else {
    }
    %c0 = arith.constant 0 : index
    %c0_1 = arith.constant 0 : index
    %3 = vector.load %arg1[%c0, %c0_1] : memref<128x128xf32, #tpu.memory_space<vmem>>, vector<128x128xf32>
    %c0_2 = arith.constant 0 : index
    %c0_3 = arith.constant 0 : index
    %4 = vector.load %arg2[%c0_2, %c0_3] : memref<1x128xf32, #tpu.memory_space<vmem>>, vector<1x128xf32>
    %cst = arith.constant dense<0.000000e+00> : vector<128xf32>
    %5 = vector.multi_reduction <add>, %3, %cst [0] : vector<128x128xf32> to vector<128xf32>
    %6 = vector.shape_cast %5 : vector<128xf32> to vector<1x128xf32>
    %7 = arith.addf %4, %6 : vector<1x128xf32>
    %c0_4 = arith.constant 0 : index
    %c0_5 = arith.constant 0 : index
    %8 = vector.load %arg2[%c0_4, %c0_5] : memref<1x128xf32, #tpu.memory_space<vmem>>, vector<1x128xf32>
    tpu.vector_store %arg2[%c0_4, %c0_5], %7 {strides = array<i32>} : memref<1x128xf32, #tpu.memory_space<vmem>>, vector<1x128xf32>,
    %c0_6 = arith.constant 0 : index
    %c0_7 = arith.constant 0 : index
    %9 = vector.load %arg3[%c0_6, %c0_7] : memref<1x128xf32, #tpu.memory_space<vmem>>, vector<1x128xf32>
    %10 = arith.mulf %3, %3 : vector<128x128xf32>
    %cst_8 = arith.constant dense<0.000000e+00> : vector<128xf32>
    %11 = vector.multi_reduction <add>, %10, %cst_8 [0] : vector<128x128xf32> to vector<128xf32>
    %12 = vector.shape_cast %11 : vector<128xf32> to vector<1x128xf32>
    %13 = arith.addf %9, %12 : vector<1x128xf32>
    %c0_9 = arith.constant 0 : index
    %c0_10 = arith.constant 0 : index
    %14 = vector.load %arg3[%c0_9, %c0_10] : memref<1x128xf32, #tpu.memory_space<vmem>>, vector<1x128xf32>
    tpu.vector_store %arg3[%c0_9, %c0_10], %13 {strides = array<i32>} : memref<1x128xf32, #tpu.memory_space<vmem>>, vector<1x128xf32>,
    return
  }
  func.func @transform_0(%arg0: i32) -> (i32, i32) {
    %c0_i32 = arith.constant 0 : i32
    %c0_i32_0 = arith.constant 0 : i32
    return %arg0, %c0_i32 : i32, i32
  }
  func.func @transform_1(%arg0: i32) -> (i32, i32) {
    %c0_i32 = arith.constant 0 : i32
    %c0_i32_0 = arith.constant 0 : i32
    %c0_i32_1 = arith.constant 0 : i32
    return %c0_i32, %c0_i32_0 : i32, i32
  }
  func.func @transform_2(%arg0: i32) -> (i32, i32) {
    %c0_i32 = arith.constant 0 : i32
    %c0_i32_0 = arith.constant 0 : i32
    %c0_i32_1 = arith.constant 0 : i32
    return %c0_i32, %c0_i32_0 : i32, i32
  }
}

module attributes {stable_mosaic.version = 11 : i64} {
  func.func @_gemm_kernel(%arg0: i32, %arg1: i32, %arg2: i32, %arg3: memref<128x128xbf16, #tpu.memory_space<vmem>>, %arg4: memref<128x128xbf16, #tpu.memory_space<vmem>>, %arg5: memref<128x128xf32, #tpu.memory_space<vmem>>, %arg6: memref<128x128xf32, #tpu.memory_space<vmem>>) attributes {dimension_semantics = [#tpu.dimension_semantics<parallel>, #tpu.dimension_semantics<parallel>, #tpu.dimension_semantics<arbitrary>], iteration_bounds = array<i64: 1, 1, 1>, scalar_prefetch = 0 : i64, scratch_operands = 1 : i64, tpu.core_type = #tpu.core_type<tc>, window_params = [{transform_indices = @transform_0, window_bounds = array<i64: 128, 128>}, {transform_indices = @transform_1, window_bounds = array<i64: 128, 128>}, {transform_indices = @transform_2, window_bounds = array<i64: 128, 128>}]} {
    %c0_i32 = arith.constant 0 : i32
    %0 = arith.cmpi eq, %arg2, %c0_i32 : i32
    %1 = arith.extui %0 : i1 to i32
    %c0_i32_0 = arith.constant 0 : i32
    %2 = arith.cmpi ne, %1, %c0_i32_0 : i32
    scf.if %2 {
      %cst_10 = arith.constant 0.000000e+00 : f32
      %12 = vector.broadcast %cst_10 : f32 to vector<128x128xf32>
      %c0_11 = arith.constant 0 : index
      %c0_12 = arith.constant 0 : index
      %13 = vector.load %arg6[%c0_11, %c0_12] : memref<128x128xf32, #tpu.memory_space<vmem>>, vector<128x128xf32>
      tpu.vector_store %arg6[%c0_11, %c0_12], %12 {strides = array<i32>} : memref<128x128xf32, #tpu.memory_space<vmem>>, vector<128x128xf32>,
    } else {
    }
    %c0 = arith.constant 0 : index
    %c0_1 = arith.constant 0 : index
    %3 = vector.load %arg6[%c0, %c0_1] : memref<128x128xf32, #tpu.memory_space<vmem>>, vector<128x128xf32>
    %c0_2 = arith.constant 0 : index
    %c0_3 = arith.constant 0 : index
    %4 = vector.load %arg3[%c0_2, %c0_3] : memref<128x128xbf16, #tpu.memory_space<vmem>>, vector<128x128xbf16>
    %c0_4 = arith.constant 0 : index
    %c0_5 = arith.constant 0 : index
    %5 = vector.load %arg4[%c0_4, %c0_5] : memref<128x128xbf16, #tpu.memory_space<vmem>>, vector<128x128xbf16>
    %cst = arith.constant dense<0.000000e+00> : vector<128x128xf32>
    %6 = tpu.matmul %4, %5, %cst {dimension_numbers = #tpu.dot_dimension_numbers<[1], [0], [0], [1], [0, 0, 1, 1], [], []>} : vector<128x128xbf16>, vector<128x128xbf16>, vector<128x128xf32> -> vector<128x128xf32>
    %7 = arith.addf %3, %6 : vector<128x128xf32>
    %c0_6 = arith.constant 0 : index
    %c0_7 = arith.constant 0 : index
    %8 = vector.load %arg6[%c0_6, %c0_7] : memref<128x128xf32, #tpu.memory_space<vmem>>, vector<128x128xf32>
    tpu.vector_store %arg6[%c0_6, %c0_7], %7 {strides = array<i32>} : memref<128x128xf32, #tpu.memory_space<vmem>>, vector<128x128xf32>,
    %c0_i32_8 = arith.constant 0 : i32
    %9 = arith.cmpi eq, %arg2, %c0_i32_8 : i32
    %10 = arith.extui %9 : i1 to i32
    %c0_i32_9 = arith.constant 0 : i32
    %11 = arith.cmpi ne, %10, %c0_i32_9 : i32
    scf.if %11 {
      %c0_10 = arith.constant 0 : index
      %c0_11 = arith.constant 0 : index
      %12 = vector.load %arg6[%c0_10, %c0_11] : memref<128x128xf32, #tpu.memory_space<vmem>>, vector<128x128xf32>
      %c0_12 = arith.constant 0 : index
      %c0_13 = arith.constant 0 : index
      %13 = vector.load %arg5[%c0_12, %c0_13] : memref<128x128xf32, #tpu.memory_space<vmem>>, vector<128x128xf32>
      tpu.vector_store %arg5[%c0_12, %c0_13], %12 {strides = array<i32>} : memref<128x128xf32, #tpu.memory_space<vmem>>, vector<128x128xf32>,
    } else {
    }
    return
  }
  func.func @transform_0(%arg0: i32, %arg1: i32, %arg2: i32) -> (i32, i32) {
    %c0_i32 = arith.constant 0 : i32
    return %arg0, %arg2 : i32, i32
  }
  func.func @transform_1(%arg0: i32, %arg1: i32, %arg2: i32) -> (i32, i32) {
    %c0_i32 = arith.constant 0 : i32
    return %arg2, %arg1 : i32, i32
  }
  func.func @transform_2(%arg0: i32, %arg1: i32, %arg2: i32) -> (i32, i32) {
    %c0_i32 = arith.constant 0 : i32
    return %arg0, %arg1 : i32, i32
  }
}

module attributes {stable_mosaic.version = 11 : i64} {
  func.func @_scale_shift_relu_kernel(%arg0: i32, %arg1: i32, %arg2: memref<128x128xf32, #tpu.memory_space<vmem>>, %arg3: memref<1x128xf32, #tpu.memory_space<vmem>>, %arg4: memref<1x128xf32, #tpu.memory_space<vmem>>, %arg5: memref<128x128xbf16, #tpu.memory_space<vmem>>) attributes {dimension_semantics = [#tpu.dimension_semantics<parallel>, #tpu.dimension_semantics<parallel>], iteration_bounds = array<i64: 1, 1>, scalar_prefetch = 0 : i64, scratch_operands = 0 : i64, tpu.core_type = #tpu.core_type<tc>, window_params = [{transform_indices = @transform_0, window_bounds = array<i64: 128, 128>}, {transform_indices = @transform_1, window_bounds = array<i64: 1, 128>}, {transform_indices = @transform_2, window_bounds = array<i64: 1, 128>}, {transform_indices = @transform_3, window_bounds = array<i64: 128, 128>}]} {
    %c0 = arith.constant 0 : index
    %c0_0 = arith.constant 0 : index
    %0 = vector.load %arg2[%c0, %c0_0] : memref<128x128xf32, #tpu.memory_space<vmem>>, vector<128x128xf32>
    %c0_1 = arith.constant 0 : index
    %c0_2 = arith.constant 0 : index
    %1 = vector.load %arg3[%c0_1, %c0_2] : memref<1x128xf32, #tpu.memory_space<vmem>>, vector<1x128xf32>
    %2 = vector.broadcast %1 : vector<1x128xf32> to vector<128x128xf32>
    %3 = arith.mulf %0, %2 : vector<128x128xf32>
    %c0_3 = arith.constant 0 : index
    %c0_4 = arith.constant 0 : index
    %4 = vector.load %arg4[%c0_3, %c0_4] : memref<1x128xf32, #tpu.memory_space<vmem>>, vector<1x128xf32>
    %5 = vector.broadcast %4 : vector<1x128xf32> to vector<128x128xf32>
    %6 = arith.addf %3, %5 : vector<128x128xf32>
    %cst = arith.constant 0.000000e+00 : f32
    %7 = vector.broadcast %cst : f32 to vector<128x128xf32>
    %8 = arith.maximumf %6, %7 : vector<128x128xf32>
    %9 = arith.truncf %8 : vector<128x128xf32> to vector<128x128xbf16>
    %c0_5 = arith.constant 0 : index
    %c0_6 = arith.constant 0 : index
    %10 = vector.load %arg5[%c0_5, %c0_6] : memref<128x128xbf16, #tpu.memory_space<vmem>>, vector<128x128xbf16>
    tpu.vector_store %arg5[%c0_5, %c0_6], %9 {strides = array<i32>} : memref<128x128xbf16, #tpu.memory_space<vmem>>, vector<128x128xbf16>,
    return
  }
  func.func @transform_0(%arg0: i32, %arg1: i32) -> (i32, i32) {
    %c0_i32 = arith.constant 0 : i32
    return %arg0, %arg1 : i32, i32
  }
  func.func @transform_1(%arg0: i32, %arg1: i32) -> (i32, i32) {
    %c0_i32 = arith.constant 0 : i32
    %c0_i32_0 = arith.constant 0 : i32
    return %c0_i32, %arg1 : i32, i32
  }
  func.func @transform_2(%arg0: i32, %arg1: i32) -> (i32, i32) {
    %c0_i32 = arith.constant 0 : i32
    %c0_i32_0 = arith.constant 0 : i32
    return %c0_i32, %arg1 : i32, i32
  }
  func.func @transform_3(%arg0: i32, %arg1: i32) -> (i32, i32) {
    %c0_i32 = arith.constant 0 : i32
    return %arg0, %arg1 : i32, i32
  }
}

module attributes {stable_mosaic.version = 11 : i64} {
  func.func @_gemm_bias_tanh_kernel(%arg0: i32, %arg1: i32, %arg2: i32, %arg3: memref<8x256xbf16, #tpu.memory_space<vmem>>, %arg4: memref<256x128xbf16, #tpu.memory_space<vmem>>, %arg5: memref<1x128xf32, #tpu.memory_space<vmem>>, %arg6: memref<8x128xf32, #tpu.memory_space<vmem>>, %arg7: memref<8x128xf32, #tpu.memory_space<vmem>>) attributes {dimension_semantics = [#tpu.dimension_semantics<parallel>, #tpu.dimension_semantics<parallel>, #tpu.dimension_semantics<arbitrary>], iteration_bounds = array<i64: 1, 1, 2>, scalar_prefetch = 0 : i64, scratch_operands = 1 : i64, tpu.core_type = #tpu.core_type<tc>, window_params = [{transform_indices = @transform_0, window_bounds = array<i64: 8, 256>}, {transform_indices = @transform_1, window_bounds = array<i64: 256, 128>}, {transform_indices = @transform_2, window_bounds = array<i64: 1, 128>}, {transform_indices = @transform_3, window_bounds = array<i64: 8, 128>}]} {
    %c0_i32 = arith.constant 0 : i32
    %0 = arith.cmpi eq, %arg2, %c0_i32 : i32
    %1 = arith.extui %0 : i1 to i32
    %c0_i32_0 = arith.constant 0 : i32
    %2 = arith.cmpi ne, %1, %c0_i32_0 : i32
    scf.if %2 {
      %cst_9 = arith.constant 0.000000e+00 : f32
      %12 = vector.broadcast %cst_9 : f32 to vector<8x128xf32>
      %c0_10 = arith.constant 0 : index
      %c0_11 = arith.constant 0 : index
      %13 = vector.load %arg7[%c0_10, %c0_11] : memref<8x128xf32, #tpu.memory_space<vmem>>, vector<8x128xf32>
      tpu.vector_store %arg7[%c0_10, %c0_11], %12 {strides = array<i32>} : memref<8x128xf32, #tpu.memory_space<vmem>>, vector<8x128xf32>,
    } else {
    }
    %c0 = arith.constant 0 : index
    %c0_1 = arith.constant 0 : index
    %3 = vector.load %arg7[%c0, %c0_1] : memref<8x128xf32, #tpu.memory_space<vmem>>, vector<8x128xf32>
    %c0_2 = arith.constant 0 : index
    %c0_3 = arith.constant 0 : index
    %4 = vector.load %arg3[%c0_2, %c0_3] : memref<8x256xbf16, #tpu.memory_space<vmem>>, vector<8x256xbf16>
    %c0_4 = arith.constant 0 : index
    %c0_5 = arith.constant 0 : index
    %5 = vector.load %arg4[%c0_4, %c0_5] : memref<256x128xbf16, #tpu.memory_space<vmem>>, vector<256x128xbf16>
    %cst = arith.constant dense<0.000000e+00> : vector<8x128xf32>
    %6 = tpu.matmul %4, %5, %cst {dimension_numbers = #tpu.dot_dimension_numbers<[1], [0], [0], [1], [0, 0, 1, 1], [], []>} : vector<8x256xbf16>, vector<256x128xbf16>, vector<8x128xf32> -> vector<8x128xf32>
    %7 = arith.addf %3, %6 : vector<8x128xf32>
    %c0_6 = arith.constant 0 : index
    %c0_7 = arith.constant 0 : index
    %8 = vector.load %arg7[%c0_6, %c0_7] : memref<8x128xf32, #tpu.memory_space<vmem>>, vector<8x128xf32>
    tpu.vector_store %arg7[%c0_6, %c0_7], %7 {strides = array<i32>} : memref<8x128xf32, #tpu.memory_space<vmem>>, vector<8x128xf32>,
    %c1_i32 = arith.constant 1 : i32
    %9 = arith.cmpi eq, %arg2, %c1_i32 : i32
    %10 = arith.extui %9 : i1 to i32
    %c0_i32_8 = arith.constant 0 : i32
    %11 = arith.cmpi ne, %10, %c0_i32_8 : i32
    scf.if %11 {
      %c0_9 = arith.constant 0 : index
      %c0_10 = arith.constant 0 : index
      %12 = vector.load %arg7[%c0_9, %c0_10] : memref<8x128xf32, #tpu.memory_space<vmem>>, vector<8x128xf32>
      %c0_11 = arith.constant 0 : index
      %c0_12 = arith.constant 0 : index
      %13 = vector.load %arg5[%c0_11, %c0_12] : memref<1x128xf32, #tpu.memory_space<vmem>>, vector<1x128xf32>
      %14 = vector.broadcast %13 : vector<1x128xf32> to vector<8x128xf32>
      %15 = arith.addf %12, %14 : vector<8x128xf32>
      %16 = math.tanh %15 : vector<8x128xf32>
      %c0_13 = arith.constant 0 : index
      %c0_14 = arith.constant 0 : index
      %17 = vector.load %arg6[%c0_13, %c0_14] : memref<8x128xf32, #tpu.memory_space<vmem>>, vector<8x128xf32>
      tpu.vector_store %arg6[%c0_13, %c0_14], %16 {strides = array<i32>} : memref<8x128xf32, #tpu.memory_space<vmem>>, vector<8x128xf32>,
    } else {
    }
    return
  }
  func.func @transform_0(%arg0: i32, %arg1: i32, %arg2: i32) -> (i32, i32) {
    %c0_i32 = arith.constant 0 : i32
    return %arg0, %arg2 : i32, i32
  }
  func.func @transform_1(%arg0: i32, %arg1: i32, %arg2: i32) -> (i32, i32) {
    %c0_i32 = arith.constant 0 : i32
    return %arg2, %arg1 : i32, i32
  }
  func.func @transform_2(%arg0: i32, %arg1: i32, %arg2: i32) -> (i32, i32) {
    %c0_i32 = arith.constant 0 : i32
    %c0_i32_0 = arith.constant 0 : i32
    return %c0_i32, %arg1 : i32, i32
  }
  func.func @transform_3(%arg0: i32, %arg1: i32, %arg2: i32) -> (i32, i32) {
    %c0_i32 = arith.constant 0 : i32
    return %arg0, %arg1 : i32, i32
  }
}

</mosaic_0001>

<bundles_post_ra>
// kernel: image_encoder_forward.6
= control target key start
LH: loop header
LB: loop body
LE: loop exit
PB: predicated region body
PF: predicated region fallthrough
CT: control target
= control target key end

     0   :  { %s391_s0 = inlined_call_operand.vmem [shape: f32[128,128], index: 0, kind: input, shape index: {}]   ;;  %s392_s1 = inlined_call_operand.vmem [shape: f32[1,128], index: 1, kind: input, shape index: {}]   ;;  %s393_s2 = inlined_call_operand.vmem [shape: f32[1,128], index: 2, kind: input, shape index: {}]   ;;  %s394_s3 = inlined_call_operand.vmem [shape: bf16[128,128], index: 3, kind: output, shape index: {}]  }
   0x1   :  { %v14_v0 = vld [vmem:[%s391_s0] sm:$0xff]  ;;  %v15_v1 = vld [vmem:[%s391_s0 + $0x8] sm:$0xff]  ;;  %v16_v6 = vld [vmem:[%s391_s0 + $0x10] sm:$0xff] }
   0x2   :  { %v286_v2 = vld [vmem:[%s392_s1] ss:$0 sm:$0xff]  ;;  %v17_v7 = vld [vmem:[%s391_s0 + $0x18] sm:$0xff]  ;;  %v19_v11 = vld [vmem:[%s391_s0 + $0x28] sm:$0xff] }
   0x3   :  { %v37_v3 = vmul.f32 %v286_v2, %v14_v0  ;;  %v38_v4 = vmul.f32 %v286_v2, %v15_v1  ;;  %v293_v5 = vld [vmem:[%s393_s2] ss:$0 sm:$0xff]  ;;  %v39_v8 = vmul.f32 %v286_v2, %v16_v6  ;;  %v40_v9 = vmul.f32 %v286_v2, %v17_v7  ;;  %v20_v12 = vld [vmem:[%s391_s0 + $0x30] sm:$0xff]  ;;  %v21_v17 = vld [vmem:[%s391_s0 + $0x38] sm:$0xff] }
   0x4   :  { %v18_v10 = vld [vmem:[%s391_s0 + $0x20] sm:$0xff]  ;;  %v42_v16 = vmul.f32 %v286_v2, %v19_v11  ;;  %v43_v20 = vmul.f32 %v286_v2, %v20_v12  ;;  %v44_v21 = vmul.f32 %v286_v2, %v21_v17  ;;  %v23_v27 = vld [vmem:[%s391_s0 + $0x48] sm:$0xff]  ;;  %v24_v32 = vld [vmem:[%s391_s0 + $0x50] sm:$0xff] }
   0x5   :  { %v60_v13 = vadd.f32 %v293_v5, %v37_v3  ;;  %v61_v14 = vadd.f32 %v293_v5, %v38_v4  ;;  %v41_v15 = vmul.f32 %v286_v2, %v18_v10  ;;  %v62_v18 = vadd.f32 %v293_v5, %v39_v8  ;;  %v22_v22 = vld [vmem:[%s391_s0 + $0x40] sm:$0xff]  ;;  %v25_v33 = vld [vmem:[%s391_s0 + $0x58] sm:$0xff]  ;;  %v27_v39 = vld [vmem:[%s391_s0 + $0x68] sm:$0xff] }
   0x6   :  { %v63_v19 = vadd.f32 %v293_v5, %v40_v9  ;;  %v65_v26 = vadd.f32 %v293_v5, %v42_v16  ;;  %v66_v30 = vadd.f32 %v293_v5, %v43_v20  ;;  %v67_v31 = vadd.f32 %v293_v5, %v44_v21  ;;  %v26_v38 = vld [vmem:[%s391_s0 + $0x60] sm:$0xff]  ;;  %v28_v44 = vld [vmem:[%s391_s0 + $0x70] sm:$0xff]  ;;  %v29_v49 = vld [vmem:[%s391_s0 + $0x78] sm:$0xff] }
   0x7   :  { %v76_v23 = vmax.f32 %v60_v13, 0.0  ;;  %v77_v24 = vmax.f32 %v61_v14, 0.0  ;;  %v64_v25 = vadd.f32 %v293_v5, %v41_v15  ;;  %v78_v28 = vmax.f32 %v62_v18, 0.0 }
   0x8   :  { %v79_v29 = vmax.f32 %v63_v19, 0.0  ;;  %v81_v36 = vmax.f32 %v65_v26, 0.0  ;;  %v45_v37 = vmul.f32 %v286_v2, %v22_v22  ;;  %v82_v41 = vmax.f32 %v66_v30, 0.0 }
   0x9   :  { %v213_v34 = vpack.c.bf16 %v77_v24, %v76_v23  ;;  %v80_v35 = vmax.f32 %v64_v25, 0.0  ;;  %v83_v42 = vmax.f32 %v67_v31, 0.0  ;;  %v46_v43 = vmul.f32 %v286_v2, %v23_v27 }
   0xa   :  { %v218_v40 = vpack.c.bf16 %v79_v29, %v78_v28  ;;  %v68_v46 = vadd.f32 %v293_v5, %v45_v37  ;;  %v47_v47 = vmul.f32 %v286_v2, %v24_v32  ;;  %v48_v48 = vmul.f32 %v286_v2, %v25_v33 }
   0xb   :  { %214 = vst [vmem:[%s394_s3] sm:$0xff] %v213_v34   ;;  %v223_v45 = vpack.c.bf16 %v81_v36, %v80_v35  ;;  %v228_v50 = vpack.c.bf16 %v83_v42, %v82_v41  ;;  %v69_v51 = vadd.f32 %v293_v5, %v46_v43  ;;  %v49_v52 = vmul.f32 %v286_v2, %v26_v38 }
   0xc   :  { %250 = vst [vmem:[%s394_s3 + $0x8] sm:$0xff] %v218_v40   ;;  %v50_v53 = vmul.f32 %v286_v2, %v27_v39  ;;  %v84_v54 = vmax.f32 %v68_v46, 0.0  ;;  %v70_v55 = vadd.f32 %v293_v5, %v47_v47  ;;  %v71_v56 = vadd.f32 %v293_v5, %v48_v48 }
   0xd   :  { %251 = vst [vmem:[%s394_s3 + $0x10] sm:$0xff] %v223_v45   ;;  %v51_v57 = vmul.f32 %v286_v2, %v28_v44  ;;  %252 = vst [vmem:[%s394_s3 + $0x18] sm:$0xff] %v228_v50   ;;  %v85_v58 = vmax.f32 %v69_v51, 0.0  ;;  %v72_v59 = vadd.f32 %v293_v5, %v49_v52  ;;  %v52_v61 = vmul.f32 %v286_v2, %v29_v49 }
   0xe   :  { %v73_v60 = vadd.f32 %v293_v5, %v50_v53  ;;  %v86_v62 = vmax.f32 %v70_v55, 0.0  ;;  %v87_v63 = vmax.f32 %v71_v56, 0.0 }
   0xf   :  { %v74_v0 = vadd.f32 %v293_v5, %v51_v57  ;;  %v233_v1 = vpack.c.bf16 %v85_v58, %v84_v54  ;;  %v88_v3 = vmax.f32 %v72_v59, 0.0  ;;  %v75_v6 = vadd.f32 %v293_v5, %v52_v61 }
  0x10   :  { %v89_v4 = vmax.f32 %v73_v60, 0.0  ;;  %v238_v7 = vpack.c.bf16 %v87_v63, %v86_v62 }
  0x11   :  { %v90_v8 = vmax.f32 %v74_v0, 0.0  ;;  %253 = vst [vmem:[%s394_s3 + $0x20] sm:$0xff] %v233_v1   ;;  %v91_v10 = vmax.f32 %v75_v6, 0.0 }
  0x12   :  { %v243_v9 = vpack.c.bf16 %v89_v4, %v88_v3  ;;  %254 = vst [vmem:[%s394_s3 + $0x28] sm:$0xff] %v238_v7  }
  0x13   :  { %v248_v2 = vpack.c.bf16 %v91_v10, %v90_v8 }
  0x14   :  { %255 = vst [vmem:[%s394_s3 + $0x30] sm:$0xff] %v243_v9  }
  0x15   :  { %256 = vst [vmem:[%s394_s3 + $0x38] sm:$0xff] %v248_v2  }

// kernel: image_encoder_forward.5
= control target key start
LH: loop header
LB: loop body
LE: loop exit
PB: predicated region body
PF: predicated region fallthrough
CT: control target
= control target key end

     0   :  { %v105_v0 = vmov 0.0   ;;  %s187_s1 = inlined_call_operand.vmem [shape: f32[1,128], index: 1, kind: output, shape index: {0}]   ;;  %s188_s2 = inlined_call_operand.vmem [shape: f32[1,128], index: 2, kind: output, shape index: {1}]   ;;  %s189_s0 = inlined_call_operand.vmem [shape: f32[128,128], index: 0, kind: input, shape index: {}]  }
   0x1   :  { %14 = vst [vmem:[%s187_s1] sm:$0x1] %v105_v0  ;;  %15 = vst [vmem:[%s188_s2] sm:$0x1] %v105_v0  ;;  %v16_v1 = vld [vmem:[%s189_s0] sm:$0xff]  ;;  %v17_v2 = vld [vmem:[%s189_s0 + $0x8] sm:$0xff] }
   0x2   :  { %v18_v3 = vld [vmem:[%s189_s0 + $0x10] sm:$0xff]  ;;  %v19_v4 = vld [vmem:[%s189_s0 + $0x18] sm:$0xff]  ;;  %v33_v5 = vadd.f32 %v17_v2, %v16_v1  ;;  %v57_v6 = vmul.f32 %v16_v1, %v16_v1  ;;  %v58_v7 = vmul.f32 %v17_v2, %v17_v2  ;;  %v20_v9 = vld [vmem:[%s189_s0 + $0x20] sm:$0xff] }
   0x3   :  { %v59_v8 = vmul.f32 %v18_v3, %v18_v3  ;;  %v60_v11 = vmul.f32 %v19_v4, %v19_v4  ;;  %v21_v13 = vld [vmem:[%s189_s0 + $0x28] sm:$0xff]  ;;  %v61_v15 = vmul.f32 %v20_v9, %v20_v9  ;;  %v22_v17 = vld [vmem:[%s189_s0 + $0x30] sm:$0xff]  ;;  %v23_v21 = vld [vmem:[%s189_s0 + $0x38] sm:$0xff] }
   0x4   :  { %v34_v10 = vadd.f32 %v33_v5, %v18_v3  ;;  %v73_v12 = vadd.f32 %v58_v7, %v57_v6  ;;  %v62_v19 = vmul.f32 %v21_v13, %v21_v13  ;;  %v63_v23 = vmul.f32 %v22_v17, %v22_v17  ;;  %v24_v25 = vld [vmem:[%s189_s0 + $0x40] sm:$0xff]  ;;  %v25_v29 = vld [vmem:[%s189_s0 + $0x48] sm:$0xff]  ;;  %v26_v33 = vld [vmem:[%s189_s0 + $0x50] sm:$0xff] }
   0x5   :  { %v64_v27 = vmul.f32 %v23_v21, %v23_v21  ;;  %v65_v31 = vmul.f32 %v24_v25, %v24_v25  ;;  %v66_v35 = vmul.f32 %v25_v29, %v25_v29  ;;  %v27_v37 = vld [vmem:[%s189_s0 + $0x58] sm:$0xff]  ;;  %v67_v39 = vmul.f32 %v26_v33, %v26_v33  ;;  %v28_v41 = vld [vmem:[%s189_s0 + $0x60] sm:$0xff]  ;;  %v29_v45 = vld [vmem:[%s189_s0 + $0x68] sm:$0xff] }
   0x6   :  { %v35_v14 = vadd.f32 %v34_v10, %v19_v4  ;;  %v74_v16 = vadd.f32 %v73_v12, %v59_v8  ;;  %v68_v43 = vmul.f32 %v27_v37, %v27_v37  ;;  %v69_v47 = vmul.f32 %v28_v41, %v28_v41  ;;  %v30_v49 = vld [vmem:[%s189_s0 + $0x70] sm:$0xff]  ;;  %v31_v53 = vld [vmem:[%s189_s0 + $0x78] sm:$0xff] }
   0x7   :  { %v70_v51 = vmul.f32 %v29_v45, %v29_v45  ;;  %v71_v55 = vmul.f32 %v30_v49, %v30_v49  ;;  %v72_v58 = vmul.f32 %v31_v53, %v31_v53 }
   0x8   :  { %v36_v18 = vadd.f32 %v35_v14, %v20_v9  ;;  %v75_v20 = vadd.f32 %v74_v16, %v60_v11  ;;  %v32_v7 = vld [vmem:[%s187_s1] sm:$0x1] }
   0x9   :  { %v56_v12 = vld [vmem:[%s188_s2] sm:$0x1] }
   0xa   :  { %v37_v22 = vadd.f32 %v36_v18, %v21_v13  ;;  %v76_v24 = vadd.f32 %v75_v20, %v61_v15 }
   0xc   :  { %v38_v26 = vadd.f32 %v37_v22, %v22_v17  ;;  %v77_v28 = vadd.f32 %v76_v24, %v62_v19 }
   0xe   :  { %v39_v30 = vadd.f32 %v38_v26, %v23_v21  ;;  %v78_v32 = vadd.f32 %v77_v28, %v63_v23 }
  0x10   :  { %v40_v34 = vadd.f32 %v39_v30, %v24_v25  ;;  %v79_v36 = vadd.f32 %v78_v32, %v64_v27 }
  0x12   :  { %v41_v38 = vadd.f32 %v40_v34, %v25_v29  ;;  %v80_v40 = vadd.f32 %v79_v36, %v65_v31 }
  0x14   :  { %v42_v42 = vadd.f32 %v41_v38, %v26_v33  ;;  %v81_v44 = vadd.f32 %v80_v40, %v66_v35 }
  0x16   :  { %v43_v46 = vadd.f32 %v42_v42, %v27_v37  ;;  %v82_v48 = vadd.f32 %v81_v44, %v67_v39 }
  0x18   :  { %v44_v50 = vadd.f32 %v43_v46, %v28_v41  ;;  %v83_v52 = vadd.f32 %v82_v48, %v68_v43 }
  0x1a   :  { %v45_v54 = vadd.f32 %v44_v50, %v29_v45  ;;  %v84_v56 = vadd.f32 %v83_v52, %v69_v47 }
  0x1c   :  { %v46_v57 = vadd.f32 %v45_v54, %v30_v49  ;;  %v85_v59 = vadd.f32 %v84_v56, %v70_v51 }
  0x1e   :  { %v47_v60 = vadd.f32 %v46_v57, %v31_v53  ;;  %v86_v61 = vadd.f32 %v85_v59, %v71_v55 }
  0x20   :  { %v48_v62 = vrot.slane %v47_v60, 4  ;;  %v87_v63 = vadd.f32 %v86_v61, %v72_v58 }
  0x22   :  { %v49_v0 = vadd.f32 %v48_v62, %v47_v60  ;;  %v88_v1 = vrot.slane %v87_v63, 4 }
  0x24   :  { %v50_v2 = vrot.slane %v49_v0, 2  ;;  %v89_v3 = vadd.f32 %v88_v1, %v87_v63 }
  0x26   :  { %v51_v4 = vadd.f32 %v50_v2, %v49_v0  ;;  %v90_v5 = vrot.slane %v89_v3, 2 }
  0x28   :  { %v52_v6 = vrot.slane %v51_v4, 1  ;;  %v91_v8 = vadd.f32 %v90_v5, %v89_v3 }
  0x2a   :  { %v53_v9 = vadd.f32 %v52_v6, %v51_v4  ;;  %v92_v10 = vrot.slane %v91_v8, 1 }
  0x2c   :  { %v54_v11 = vadd.f32 %v53_v9, %v32_v7  ;;  %v93_v13 = vadd.f32 %v92_v10, %v91_v8 }
  0x2e   :  { %55 = vst [vmem:[%s187_s1] sm:$0x1] %v54_v11  ;;  %v94_v14 = vadd.f32 %v93_v13, %v56_v12 }
  0x30   :  { %95 = vst [vmem:[%s188_s2] sm:$0x1] %v94_v14 }

// kernel: image_encoder_forward.4
= control target key start
LH: loop header
LB: loop body
LE: loop exit
PB: predicated region body
PF: predicated region fallthrough
CT: control target
= control target key end

     0   :  { %s551_s1 = inlined_call_operand.vmem [shape: bf16[128,128], index: 1, kind: input, shape index: {}]   ;;  %s552_s0 = inlined_call_operand.vmem [shape: bf16[128,128], index: 0, kind: input, shape index: {}]   ;;  %s553_s2 = inlined_call_operand.vmem [shape: f32[128,128], index: 2, kind: output, shape index: {}]  }
   0x1   :  { %v424_v0 = vld [vmem:[%s551_s1 + $0x38] sm:$0xff]   ;;  %v425_v1 = vld [vmem:[%s551_s1 + $0x30] sm:$0xff]   ;;  %v426_v2 = vld [vmem:[%s551_s1 + $0x28] sm:$0xff]  }
   0x2   :  { %376 = vmatprep.subr.bf16.mxu0 %v424_v0  ;;  %408 = vmatprep.subr.bf16.mxu1 %v424_v0  ;;  %v427_v3 = vld [vmem:[%s551_s1 + $0x20] sm:$0xff]   ;;  %v428_v6 = vld [vmem:[%s551_s1 + $0x18] sm:$0xff]   ;;  %v429_v7 = vld [vmem:[%s551_s1 + $0x10] sm:$0xff]  }
   0x3   :  { %377 = vmatpush3.bf16.msra.mxu0 %v424_v0  ;;  %416 = vmatpush3.bf16.msra.mxu1 %v424_v0  ;;  %v432_v4 = vld [vmem:[%s552_s0] sm:$0xff]   ;;  %v430_v8 = vld [vmem:[%s551_s1 + $0x8] sm:$0xff]   ;;  %v436_v12 = vld [vmem:[%s552_s0 + $0x10] sm:$0xff]  }
   0x4   :  { %378 = vmatprep.subr.bf16.mxu0 %v425_v1  ;;  %409 = vmatprep.subr.bf16.mxu1 %v425_v1  ;;  %v433_v5 = vld [vmem:[%s552_s0 + $0x20] sm:$0xff]   ;;  %v434_v10 = vld [vmem:[%s552_s0 + $0x8] sm:$0xff]   ;;  %v437_v13 = vld [vmem:[%s552_s0 + $0x30] sm:$0xff]  }
   0x5   :  { %392 = vmatprep.mubr.bf16.mxu0 %v432_v4  ;;  %400 = vmatprep.mubr.bf16.mxu1 %v433_v5  ;;  %v431_v9 = vld [vmem:[%s551_s1] sm:$0xff]   ;;  %v435_v11 = vld [vmem:[%s552_s0 + $0x28] sm:$0xff]   ;;  %v438_v14 = vld [vmem:[%s552_s0 + $0x18] sm:$0xff]  }
   0x6   :  { %v439_v15 = vld [vmem:[%s552_s0 + $0x38] sm:$0xff]  }
   0x7   :  { %379 = vmatpush3.bf16.msra.mxu0 %v425_v1  ;;  %417 = vmatpush3.bf16.msra.mxu1 %v425_v1 }
   0x8   :  { %380 = vmatprep.subr.bf16.mxu0 %v426_v2  ;;  %410 = vmatprep.subr.bf16.mxu1 %v426_v2 }
   0xb   :  { %381 = vmatpush3.bf16.msra.mxu0 %v426_v2  ;;  %418 = vmatpush3.bf16.msra.mxu1 %v426_v2 }
   0xc   :  { %382 = vmatprep.subr.bf16.mxu0 %v427_v3  ;;  %411 = vmatprep.subr.bf16.mxu1 %v427_v3 }
   0xf   :  { %383 = vmatpush3.bf16.msra.mxu0 %v427_v3  ;;  %419 = vmatpush3.bf16.msra.mxu1 %v427_v3 }
  0x10   :  { %384 = vmatprep.subr.bf16.mxu0 %v428_v6  ;;  %412 = vmatprep.subr.bf16.mxu1 %v428_v6 }
  0x13   :  { %385 = vmatpush3.bf16.msra.mxu0 %v428_v6  ;;  %420 = vmatpush3.bf16.msra.mxu1 %v428_v6 }
  0x14   :  { %386 = vmatprep.subr.bf16.mxu0 %v429_v7  ;;  %413 = vmatprep.subr.bf16.mxu1 %v429_v7 }
  0x17   :  { %387 = vmatpush3.bf16.msra.mxu0 %v429_v7  ;;  %421 = vmatpush3.bf16.msra.mxu1 %v429_v7 }
  0x18   :  { %388 = vmatprep.subr.bf16.mxu0 %v430_v8  ;;  %414 = vmatprep.subr.bf16.mxu1 %v430_v8 }
  0x1b   :  { %389 = vmatpush3.bf16.msra.mxu0 %v430_v8  ;;  %422 = vmatpush3.bf16.msra.mxu1 %v430_v8 }
  0x1c   :  { %390 = vmatprep.subr.bf16.mxu0 %v431_v9  ;;  %415 = vmatprep.subr.bf16.mxu1 %v431_v9 }
  0x1f   :  { %391 = vmatpush3.bf16.msra.mxu0 %v431_v9  ;;  %423 = vmatpush3.bf16.msra.mxu1 %v431_v9 }
  0x22   :  { %393 = vmatmul.mubr.bf16.vlgmr.msra.gmra.mxu0 %v434_v10  ;;  %401 = vmatmul.mubr.bf16.vlgmr.msra.gmra.mxu1 %v435_v11 }
  0x23   :  { %396 = vmatprep.mubr.bf16.mxu0 %v436_v12  ;;  %404 = vmatprep.mubr.bf16.mxu1 %v437_v13 }
  0x2a   :  { %397 = vmatmul.mubr.bf16.gmra.mxu0 %v438_v14  ;;  %405 = vmatmul.mubr.bf16.gmra.mxu1 %v439_v15 }
  0xe2   :  { %v394_v16 = vpop.f32.mrf.mxu0  ;;  %v402_v17 = vpop.f32.mrf.mxu1 }
  0xe3   :  { %326 = vst [vmem:[%s553_s2 + $0x10] sm:$0xff] %v394_v16  ;;  %334 = vst [vmem:[%s553_s2 + $0x50] sm:$0xff] %v402_v17 }
  0xe4   :  { %v210_v18 = vpop.f32.mrf.mxu0  ;;  %v242_v19 = vpop.f32.mrf.mxu1 }
  0xe5   :  { %324 = vst [vmem:[%s553_s2] sm:$0xff] %v210_v18  ;;  %332 = vst [vmem:[%s553_s2 + $0x40] sm:$0xff] %v242_v19 }
  0xe6   :  { %v395_v20 = vpop.f32.mrf.mxu0  ;;  %v403_v21 = vpop.f32.mrf.mxu1 }
  0xe7   :  { %327 = vst [vmem:[%s553_s2 + $0x18] sm:$0xff] %v395_v20  ;;  %335 = vst [vmem:[%s553_s2 + $0x58] sm:$0xff] %v403_v21 }
  0xe8   :  { %v213_v22 = vpop.f32.mrf.mxu0  ;;  %v245_v23 = vpop.f32.mrf.mxu1 }
  0xe9   :  { %325 = vst [vmem:[%s553_s2 + $0x8] sm:$0xff] %v213_v22  ;;  %333 = vst [vmem:[%s553_s2 + $0x48] sm:$0xff] %v245_v23 }
  0xea   :  { %v398_v24 = vpop.f32.mrf.mxu0  ;;  %v406_v25 = vpop.f32.mrf.mxu1 }
  0xeb   :  { %330 = vst [vmem:[%s553_s2 + $0x30] sm:$0xff] %v398_v24  ;;  %338 = vst [vmem:[%s553_s2 + $0x70] sm:$0xff] %v406_v25 }
  0xec   :  { %v226_v26 = vpop.f32.mrf.mxu0  ;;  %v258_v27 = vpop.f32.mrf.mxu1 }
  0xed   :  { %328 = vst [vmem:[%s553_s2 + $0x20] sm:$0xff] %v226_v26  ;;  %336 = vst [vmem:[%s553_s2 + $0x60] sm:$0xff] %v258_v27 }
  0xee   :  { %v399_v28 = vpop.f32.mrf.mxu0  ;;  %v407_v29 = vpop.f32.mrf.mxu1 }
  0xef   :  { %331 = vst [vmem:[%s553_s2 + $0x38] sm:$0xff] %v399_v28  ;;  %339 = vst [vmem:[%s553_s2 + $0x78] sm:$0xff] %v407_v29 }
  0xf0   :  { %v229_v30 = vpop.f32.mrf.mxu0  ;;  %v261_v31 = vpop.f32.mrf.mxu1 }
  0xf1   :  { %329 = vst [vmem:[%s553_s2 + $0x28] sm:$0xff] %v229_v30  ;;  %337 = vst [vmem:[%s553_s2 + $0x68] sm:$0xff] %v261_v31 }

// kernel: image_encoder_forward.7
= control target key start
LH: loop header
LB: loop body
LE: loop exit
PB: predicated region body
PF: predicated region fallthrough
CT: control target
= control target key end

     0   :  { %s709_s12 = smov 0   ;;  %s711_s13 = smov 0   ;;  %s772_s0 = inlined_call_operand.vmem [shape: bf16[8,512], index: 0, kind: input, shape index: {}]   ;;  %s773_s1 = inlined_call_operand.vmem [shape: bf16[512,128], index: 1, kind: input, shape index: {}]   ;;  %s774_s2 = inlined_call_operand.vmem [shape: f32[1,128], index: 2, kind: input, shape index: {}]   ;;  %s775_s3 = inlined_call_operand.vmem [shape: f32[8,128], index: 3, kind: output, shape index: {}]  }
   0x1   :  { %s713_s14 = smov 0  }
   0x2 LB: > { %s25_s15 = sadd.s32 1, %s682_s13  ;;  %p568_p0 = scmp.ge.s32.totalorder %s686_s14, 1  ;;  %s686_s14 = sphi %s713_s14, %s13_s14   ;;  %s682_s13 = sphi %s711_s13, %s777_s13   ;;  %s678_s12 = sphi %s709_s12, %s776_s12  }
   0x3   : > { %p26_p1 = scmp.ge.s32.totalorder %s25_s15, 2  ;;  %p189_p2 = scmp.lt.s32.totalorder %s686_s14, 3 }
   0x5   : > { %s779_s15 = smov (%p26_p1, %s25_s15), 0  ;;  %p190_p3 = pnand %p568_p0, %p189_p2 }
   0x6   : > { %s569_s16 = sshll.u32 (!%p190_p3), %s678_s12, 1  ;;  %s571_s17 = sshll.u32 (!%p190_p3), %s678_s12, 5 }
   0x7   : > { %193 = sbr.rel (%p190_p3) target bundleno = 279 (0x117), region = 32  ;;  %p233_p4 = scmp.lt.s32.totalorder (!%p190_p3), %s569_s16, 3 }
   0x8   : > { %p241_p5 = scmp.lt.s32.totalorder (!%p190_p3), %s571_s17, 63  ;;  %p573_p6 = scmp.ne.s32.totalorder (!%p190_p3), %s678_s12, 0 }
   0xc   : > { %s781_s16 = smov (!%p233_p4, %s569_s16), 3  ;;  %s783_s17 = smov (!%p241_p5, %s571_s17), 63 }
   0xd   : > { %s570_s18 = sshll.u32 %s781_s16, 2  ;;  %s572_s22 = sshll.u32 %s783_s17, 2 }
   0xe   : > { %s238_s21 = scalar_lea.vmem %s772_s0, %s570_s18  ;;  %s737_s25 = scalar_lea.vmem %s773_s1, %s572_s22 }
   0xf   : > { %263 = sbr.rel (%p573_p6) target bundleno = 22 (0x16), region = 36 }
  0x14   : > { %v688_v0 = vmov 0.0  }
  0x15   : > { %264 = vst [vmem:[#allocation2] sm:$0xff] %v688_v0 }
  0x16 PF: > { %v644_v1 = vld [vmem:[%s737_s25 + $0x78] sm:$0xff]   ;;  %v646_v3 = vld [vmem:[%s737_s25 + $0x70] sm:$0xff]   ;;  %v648_v5 = vld [vmem:[%s737_s25 + $0x68] sm:$0xff]   ;;  %p592_p7 = scmp.ne.s32.totalorder %s678_s12, 1 }
  0x17   : > { %v645_v2 = vld [vmem:[%s737_s25 + $0x38] sm:$0xff]   ;;  %597 = vmatprep.subr.bf16.mxu0 %v644_v1  ;;  %v647_v4 = vld [vmem:[%s737_s25 + $0x30] sm:$0xff]   ;;  %v649_v6 = vld [vmem:[%s737_s25 + $0x28] sm:$0xff]  }
  0x18   : > { %598 = vmatpush3.bf16.msra.mxu0 %v645_v2  ;;  %v650_v7 = vld [vmem:[%s737_s25 + $0x60] sm:$0xff]   ;;  %v652_v9 = vld [vmem:[%s737_s25 + $0x58] sm:$0xff]   ;;  %v654_v11 = vld [vmem:[%s737_s25 + $0x50] sm:$0xff]  }
  0x19   : > { %599 = vmatprep.subr.bf16.mxu0 %v646_v3  ;;  %v651_v8 = vld [vmem:[%s737_s25 + $0x20] sm:$0xff]   ;;  %v653_v10 = vld [vmem:[%s737_s25 + $0x18] sm:$0xff]   ;;  %v655_v14 = vld [vmem:[%s737_s25 + $0x10] sm:$0xff]  }
  0x1a   : > { %v266_v12 = vld [vmem:[%s238_s21] sm:$0xff]  ;;  %v656_v15 = vld [vmem:[%s737_s25 + $0x48] sm:$0xff]  }
  0x1b   : > { %v575_v13 = vcombine.high %v266_v12, %v266_v12  ;;  %v657_v16 = vld [vmem:[%s737_s25 + $0x8] sm:$0xff]   ;;  %v658_v17 = vld [vmem:[%s737_s25 + $0x40] sm:$0xff]   ;;  %v574_v19 = vcombine.low %v266_v12, %v266_v12 }
  0x1c   : > { %600 = vmatpush3.bf16.msra.mxu0 %v647_v4  ;;  %v659_v18 = vld [vmem:[%s737_s25] sm:$0xff]  }
  0x1d   : > { %601 = vmatprep.subr.bf16.mxu0 %v648_v5  ;;  %434 = vmatprep.mubr.bf16.mxu0 %v575_v13  ;;  %v265_v21 = vld [vmem:[#allocation2] sm:$0xff] }
  0x20   : > { %602 = vmatpush3.bf16.msra.mxu0 %v649_v6 }
  0x21   : > { %603 = vmatprep.subr.bf16.mxu0 %v650_v7 }
  0x24   : > { %604 = vmatpush3.bf16.msra.mxu0 %v651_v8 }
  0x25   : > { %605 = vmatprep.subr.bf16.mxu0 %v652_v9 }
  0x28   : > { %606 = vmatpush3.bf16.msra.mxu0 %v653_v10 }
  0x29   : > { %607 = vmatprep.subr.bf16.mxu0 %v654_v11 }
  0x2c   : > { %608 = vmatpush3.bf16.msra.mxu0 %v655_v14 }
  0x2d   : > { %609 = vmatprep.subr.bf16.mxu0 %v656_v15 }
  0x30   : > { %610 = vmatpush3.bf16.msra.mxu0 %v657_v16 }
  0x31   : > { %611 = vmatprep.subr.bf16.mxu0 %v658_v17 }
  0x34   : > { %612 = vmatpush3.bf16.msra.mxu0 %v659_v18 }
  0x37   : > { %435 = vmatmul.mubr.bf16.vlgmr.msra.gmra.mxu0 %v574_v19 }
  0xf7   : > { %v613_v20 = vpop.f32.mrf.mxu0 }
  0xf9   : > { %v614_v22 = vpop.f32.mrf.mxu0 }
  0xfa   : > { %v615_v23 = vadd.f32 %v614_v22, %v613_v20  ;;  %447 = sbr.rel (%p592_p7) target bundleno = 279 (0x117), region = 40 }
  0xfb   : > { %v616_v24 = vpop.f32.mrf.mxu0 }
  0xfc   : > { %v442_v25 = vadd.f32 %v615_v23, %v265_v21 }
  0xfd   : > { %v617_v26 = vpop.f32.mrf.mxu0 }
  0xfe   : > { %443 = vst [vmem:[#allocation2] sm:$0xff] %v442_v25 }
  0xff   : > { %v593_v28 = vld [vmem:[%s774_s2] ss:$0 sm:$0xff] }
 0x105   : > { %v448_v27 = vld [vmem:[#allocation2] sm:$0xff] }
 0x106   : > { %v456_v29 = vadd.f32 %v593_v28, %v448_v27 }
 0x108   : > { %662 = vtanh.f32 %v456_v29 }
 0x115   : > { %v663_v30 = vpop.eup %662 }
 0x116   : > { %458 = vst [vmem:[%s775_s3] sm:$0xff] %v663_v30 }
 0x117 PF: > { %s13_s14 = sadd.s32 1, %s686_s14   ;;  %s776_s12 = smov %s682_s13 }
 0x118   : > { %p10_p8 = scmp.ge.s32.totalorder %s13_s14, 4   ;;  %s777_s13 = smov %s779_s15 }
 0x11a   :  { %12 = sbr.rel (!%p10_p8) target bundleno = 2 (0x2), region = 76 }

</bundles_post_ra>
